<compile_context>
chip_gen: v6e
topology: v6e:2x2x1
jax: 0.10.0
libtpu: 0.0.40
codegen_flags: <defaults>
</compile_context>

<pallas_src>
import functools

import jax
import jax.numpy as jnp
from jax import lax
from jax.experimental import pallas as pl
from jax.experimental.pallas import tpu as pltpu

_NEG = -1e30  # "minus infinity" that stays NaN-free under subtraction / exp


def _round_up(x, m):
    return ((x + m - 1) // m) * m


def adasoftmax_kernel(x_ref, w_ref, b_ref, wg_ref, bg_ref, prob_ref,
                      m_scr, l_scr, c_scr, g_scr, *, cutoff, tn):
    """Two-pass adaptive log-softmax over column tiles of the fused projection."""
    p = pl.program_id(1)          # 0 = stats pass, 1 = write pass
    j = pl.program_id(2)          # column tile

    n_clusters = len(cutoff) - 1
    n_seg = n_clusters + 1        # segment 0 = head vocab, s>=1 = tail cluster s-1

    x = x_ref[...]

    # Fused logits for this column tile (output-layout columns [j*tn, (j+1)*tn)).
    logits = (jnp.dot(x, w_ref[...], preferred_element_type=jnp.float32)
              + b_ref[...].astype(jnp.float32))                      # (tb, tn)

    # Per-column segment id for this tile (static cutoffs, runtime tile offset).
    col = j * tn + lax.broadcasted_iota(jnp.int32, (1, tn), 1)       # (1, tn)
    seg = jnp.zeros((1, tn), jnp.int32)
    for c in cutoff[:-1]:
        seg = seg + (col >= c).astype(jnp.int32)
    masks = [seg == s for s in range(n_seg)]                          # (1, tn) each

    # ---- pass 0, first tile: init stats and fold in the cluster-gate logits ----
    @pl.when((p == 0) & (j == 0))
    def _():
        m_scr[...] = jnp.full(m_scr.shape, _NEG, jnp.float32)
        l_scr[...] = jnp.zeros(l_scr.shape, jnp.float32)
        g = (jnp.dot(x, wg_ref[...], preferred_element_type=jnp.float32)
             + bg_ref[...].astype(jnp.float32))                      # (tb, G_pad)
        g_scr[...] = g
        mg = jnp.max(g, axis=-1, keepdims=True)
        m_scr[0] = mg                                                # head max (gates only so far)
        l_scr[0] = jnp.sum(jnp.exp(g - mg), axis=-1, keepdims=True)

    # ---- pass 0: online (max, sum-exp) update, per segment present in the tile ----
    @pl.when(p == 0)
    def _():
        m_old = [m_scr[s] for s in range(n_seg)]
        l_old = [l_scr[s] for s in range(n_seg)]
        m_new = []
        for s in range(n_seg):
            tmax = jnp.max(jnp.where(masks[s], logits, _NEG), axis=-1, keepdims=True)
            m_new.append(jnp.maximum(m_old[s], tmax))
        # one exp over the tile, each column shifted by its own segment max
        moff = jnp.where(masks[0], m_new[0], 0.0)
        for s in range(1, n_seg):
            moff = jnp.where(masks[s], m_new[s], moff)
        e = jnp.exp(logits - moff)
        for s in range(n_seg):
            part = jnp.sum(jnp.where(masks[s], e, 0.0), axis=-1, keepdims=True)
            m_scr[s] = m_new[s]
            l_scr[s] = l_old[s] * jnp.exp(m_old[s] - m_new[s]) + part

    # ---- pass 1, first tile: stats -> per-segment additive corrections ----
    @pl.when((p == 1) & (j == 0))
    def _():
        norm0 = m_scr[0] + jnp.log(l_scr[0])      # head log-normalizer (incl. gates)
        c_scr[0] = -norm0
        g = g_scr[...]
        for s in range(1, n_seg):
            gate_lsm = g[:, s - 1:s] - norm0      # log p(cluster s-1 | x)
            c_scr[s] = gate_lsm - (m_scr[s] + jnp.log(l_scr[s]))

    # ---- pass 1: recompute logits, add correction, one lane-dense store ----
    @pl.when(p == 1)
    def _():
        corr = jnp.where(masks[0], c_scr[0], 0.0)
        for s in range(1, n_seg):
            corr = jnp.where(masks[s], c_scr[s], corr)
        prob_ref[...] = (logits + corr).astype(prob_ref.dtype)


def ada_softmax_generator_forward(x, wh, bh, wt, bt, cutoff, *,
                                  tb=256, tn=512, weight_dtype=None):
    """x: [B, D]; wh: [D, cutoff[0]+n_clusters]; bh: [1, .]; wt/bt: concatenated tails.

    Returns prob: [B, cutoff[-1]] log-probabilities over the full vocabulary.
    """
    cutoff = tuple(int(c) for c in cutoff)
    assert len(cutoff) >= 2
    B, D = x.shape
    c0 = cutoff[0]
    n_clusters = len(cutoff) - 1
    n_seg = n_clusters + 1
    V = cutoff[-1]

    wdt = x.dtype if weight_dtype is None else jnp.dtype(weight_dtype)

    # Fused projection in OUTPUT layout: [head vocab | tail_0 | ... | tail_{n-1}].
    w_vocab = jnp.concatenate([wh[:, :c0], wt], axis=1)              # (D, V)
    b_vocab = jnp.concatenate([bh[:, :c0], bt], axis=1)              # (1, V)
    # Cluster-gate columns of the head Linear (tiny resident matmul).
    wg = wh[:, c0:]                                                  # (D, n_clusters)
    bg = bh[:, c0:]

    # ---- tiling (only standard edge-partial blocks; never block > array) ----
    tb = int(tb)
    tn = int(tn)
    tb = B if B < tb else tb
    if V < tn:
        tn = V                       # single exact column tile (full-dim block)
    else:
        tn = _round_up(tn, 128)      # lane-dense 128-multiple column tiles
    nb = (B + tb - 1) // tb
    nj = (V + tn - 1) // tn
    V_pad = nj * tn

    # Pad the fused weight to a whole number of column tiles: zero weights,
    # -1e30 bias => exp()==0, so pad columns never pollute the segment stats.
    if V_pad != V:
        w_vocab = jnp.pad(w_vocab, ((0, 0), (0, V_pad - V)))
        b_vocab = jnp.pad(b_vocab, ((0, 0), (0, V_pad - V)), constant_values=_NEG)
    G_pad = _round_up(n_clusters, 128)
    if G_pad != n_clusters:
        wg = jnp.pad(wg, ((0, 0), (0, G_pad - n_clusters)))
        bg = jnp.pad(bg, ((0, 0), (0, G_pad - n_clusters)), constant_values=_NEG)

    w_vocab = w_vocab.astype(wdt)
    b_vocab = b_vocab.astype(wdt)
    wg = wg.astype(wdt)
    bg = bg.astype(wdt)

    kernel = functools.partial(adasoftmax_kernel, cutoff=cutoff, tn=tn)

    xbytes = x.dtype.itemsize
    wbytes = jnp.dtype(wdt).itemsize
    # double-buffered working set (reviewer formula) + small scratch
    est = (2 * (tb * D * xbytes + (D + 1) * tn * wbytes + tb * tn * xbytes
                + (D + 1) * G_pad * wbytes)
           + 4 * (3 * n_seg * tb + tb * G_pad))
    vmem_limit = int(min(100 * 2**20, max(32 * 2**20, 2 * est)))

    cost = pl.CostEstimate(
        flops=int(2 * B * D * (2 * V_pad + G_pad)),
        transcendentals=int(B * (V_pad + G_pad)),
        bytes_accessed=int(B * D * xbytes + 2 * nb * (D + 1) * V_pad * wbytes
                           + (D + 1) * G_pad * wbytes + B * V * xbytes),
    )

    out = pl.pallas_call(
        kernel,
        out_shape=jax.ShapeDtypeStruct((B, V), x.dtype),
        grid_spec=pltpu.PrefetchScalarGridSpec(
            num_scalar_prefetch=0,
            grid=(nb, 2, nj),
            in_specs=[
                pl.BlockSpec((tb, D), lambda b, p, j: (b, 0)),       # x (resident per batch tile)
                pl.BlockSpec((D, tn), lambda b, p, j: (0, j)),       # fused weight column tile
                pl.BlockSpec((1, tn), lambda b, p, j: (0, j)),       # fused bias column tile
                pl.BlockSpec((D, G_pad), lambda b, p, j: (0, 0)),    # gate weight (resident)
                pl.BlockSpec((1, G_pad), lambda b, p, j: (0, 0)),    # gate bias (resident)
            ],
            # Output block stays parked at (b, 0) during the stats pass (no
            # writeback), then advances with j during pass 1: each [tb, tn]
            # block of prob is written back to HBM exactly once.
            out_specs=pl.BlockSpec((tb, tn), lambda b, p, j: (b, j * p)),
            scratch_shapes=[
                pltpu.VMEM((n_seg, tb, 1), jnp.float32),   # running max per segment
                pltpu.VMEM((n_seg, tb, 1), jnp.float32),   # running sum-exp per segment
                pltpu.VMEM((n_seg, tb, 1), jnp.float32),   # per-segment output correction
                pltpu.VMEM((tb, G_pad), jnp.float32),      # cluster-gate logits
            ],
        ),
        compiler_params=pltpu.CompilerParams(
            dimension_semantics=("parallel", "arbitrary", "arbitrary"),
            vmem_limit_bytes=vmem_limit,
        ),
        cost_estimate=cost,
    )(x, w_vocab, b_vocab, wg, bg)
    return out


def reference_forward(x, wh, bh, wt, bt, cutoff):
    head_lsm = jax.nn.log_softmax(x @ wh + bh, axis=1)
    c0 = cutoff[0]
    cols = [head_lsm[:, :c0]]
    tail_logits = x @ wt + bt
    for i in range(len(cutoff) - 1):
        seg = tail_logits[:, cutoff[i] - c0: cutoff[i + 1] - c0]
        cols.append(jax.nn.log_softmax(seg, axis=1) + head_lsm[:, c0 + i: c0 + i + 1])
    return jnp.concatenate(cols, axis=1)


if __name__ == "__main__":
    # small shapes consistent with the module
    input_size = 32
    cutoff = [8, 16, 32]                   # head vocab [0,8), two tail clusters
    B = 16

    n_clusters = len(cutoff) - 1
    output_size = cutoff[0] + n_clusters   # head Linear width = 10
    tail_total = cutoff[-1] - cutoff[0]    # concatenated tails = 24

    key = jax.random.PRNGKey(0)
    kx, kwh, kbh, kwt, kbt = jax.random.split(key, 5)
    scale = 1.0 / (input_size ** 0.5)
    x = jax.random.normal(kx, (B, input_size), dtype=jnp.float32)
    wh = jax.random.uniform(kwh, (input_size, output_size), jnp.float32, -scale, scale)
    bh = jax.random.uniform(kbh, (1, output_size), jnp.float32, -scale, scale)
    wt = jax.random.uniform(kwt, (input_size, tail_total), jnp.float32, -scale, scale)
    bt = jax.random.uniform(kbt, (1, tail_total), jnp.float32, -scale, scale)

    # f32 path, exact-ish check
    prob = jax.block_until_ready(ada_softmax_generator_forward(x, wh, bh, wt, bt, cutoff))
    ref = reference_forward(x, wh, bh, wt, bt, cutoff)
    assert prob.shape == (B, cutoff[-1])
    assert jnp.allclose(prob, ref, atol=1e-4, rtol=1e-5), "mismatch vs reference (f32)"

    # partial batch tile (B not a multiple of 8, handled without padding/slicing)
    B2 = 13
    x2 = jax.random.normal(jax.random.PRNGKey(1), (B2, input_size), dtype=jnp.float32)
    prob2 = jax.block_until_ready(ada_softmax_generator_forward(x2, wh, bh, wt, bt, cutoff))
    ref2 = reference_forward(x2, wh, bh, wt, bt, cutoff)
    assert prob2.shape == (B2, cutoff[-1])
    assert jnp.allclose(prob2, ref2, atol=1e-4, rtol=1e-5), "mismatch vs reference (B=13)"

    # bf16 activations/weights (f32 MXU accumulation + f32 softmax math in-kernel)
    xb = x.astype(jnp.bfloat16)
    prob3 = jax.block_until_ready(
        ada_softmax_generator_forward(xb, wh, bh, wt, bt, cutoff,
                                      weight_dtype=jnp.bfloat16))
    assert prob3.shape == (B, cutoff[-1])
    assert jnp.allclose(prob3.astype(jnp.float32), ref, atol=0.25, rtol=0.0), \
        "mismatch vs reference (bf16)"

    print("KERNEL_OK")
</pallas_src>

<mosaic_0001>
module attributes {stable_mosaic.version = 11 : i64} {
  func.func @adasoftmax_kernel(%arg0: i32, %arg1: i32, %arg2: i32, %arg3: memref<16x32xf32, #tpu.memory_space<vmem>>, %arg4: memref<32x32xf32, #tpu.memory_space<vmem>>, %arg5: memref<1x32xf32, #tpu.memory_space<vmem>>, %arg6: memref<32x128xf32, #tpu.memory_space<vmem>>, %arg7: memref<1x128xf32, #tpu.memory_space<vmem>>, %arg8: memref<16x32xf32, #tpu.memory_space<vmem>>, %arg9: memref<3x16x1xf32, #tpu.memory_space<vmem>>, %arg10: memref<3x16x1xf32, #tpu.memory_space<vmem>>, %arg11: memref<3x16x1xf32, #tpu.memory_space<vmem>>, %arg12: memref<16x128xf32, #tpu.memory_space<vmem>>) attributes {dimension_semantics = [#tpu.dimension_semantics<parallel>, #tpu.dimension_semantics<arbitrary>, #tpu.dimension_semantics<arbitrary>], iteration_bounds = array<i64: 1, 2, 1>, scalar_prefetch = 0 : i64, scratch_operands = 4 : i64, tpu.core_type = #tpu.core_type<tc>, window_params = [{transform_indices = @transform_0, window_bounds = array<i64: 16, 32>}, {transform_indices = @transform_1, window_bounds = array<i64: 32, 32>}, {transform_indices = @transform_2, window_bounds = array<i64: 1, 32>}, {pipeline_mode = #tpu.pipeline_mode<synchronous>, transform_indices = @transform_3, window_bounds = array<i64: 32, 128>}, {pipeline_mode = #tpu.pipeline_mode<synchronous>, transform_indices = @transform_4, window_bounds = array<i64: 1, 128>}, {transform_indices = @transform_5, window_bounds = array<i64: 16, 32>}]} {
    %c0 = arith.constant 0 : index
    %c0_0 = arith.constant 0 : index
    %0 = vector.load %arg3[%c0, %c0_0] : memref<16x32xf32, #tpu.memory_space<vmem>>, vector<16x32xf32>
    %c0_1 = arith.constant 0 : index
    %c0_2 = arith.constant 0 : index
    %1 = vector.load %arg4[%c0_1, %c0_2] : memref<32x32xf32, #tpu.memory_space<vmem>>, vector<32x32xf32>
    %cst = arith.constant dense<0.000000e+00> : vector<16x32xf32>
    %2 = tpu.matmul %0, %1, %cst {dimension_numbers = #tpu.dot_dimension_numbers<[1], [0], [0], [1], [0, 0, 1, 1], [], []>} : vector<16x32xf32>, vector<32x32xf32>, vector<16x32xf32> -> vector<16x32xf32>
    %c0_3 = arith.constant 0 : index
    %c0_4 = arith.constant 0 : index
    %3 = vector.load %arg5[%c0_3, %c0_4] : memref<1x32xf32, #tpu.memory_space<vmem>>, vector<1x32xf32>
    %4 = vector.broadcast %3 : vector<1x32xf32> to vector<16x32xf32>
    %5 = arith.addf %2, %4 : vector<16x32xf32>
    %c32_i32 = arith.constant 32 : i32
    %6 = arith.muli %arg2, %c32_i32 : i32
    %7 = tpu.iota {dimensions = array<i32: 1>} : vector<1x32xi32>
    %8 = vector.broadcast %6 : i32 to vector<1x32xi32>
    %9 = arith.addi %8, %7 : vector<1x32xi32>
    %c0_i32 = arith.constant 0 : i32
    %10 = vector.broadcast %c0_i32 : i32 to vector<1x32xi32>
    %c8_i32 = arith.constant 8 : i32
    %11 = vector.broadcast %c8_i32 : i32 to vector<1x32xi32>
    %12 = arith.cmpi sge, %9, %11 : vector<1x32xi32>
    %13 = arith.extui %12 : vector<1x32xi1> to vector<1x32xi32>
    %14 = arith.addi %10, %13 : vector<1x32xi32>
    %c16_i32 = arith.constant 16 : i32
    %15 = vector.broadcast %c16_i32 : i32 to vector<1x32xi32>
    %16 = arith.cmpi sge, %9, %15 : vector<1x32xi32>
    %17 = arith.extui %16 : vector<1x32xi1> to vector<1x32xi32>
    %18 = arith.addi %14, %17 : vector<1x32xi32>
    %c0_i32_5 = arith.constant 0 : i32
    %19 = vector.broadcast %c0_i32_5 : i32 to vector<1x32xi32>
    %20 = arith.cmpi eq, %18, %19 : vector<1x32xi32>
    %c1_i32 = arith.constant 1 : i32
    %21 = vector.broadcast %c1_i32 : i32 to vector<1x32xi32>
    %22 = arith.cmpi eq, %18, %21 : vector<1x32xi32>
    %c2_i32 = arith.constant 2 : i32
    %23 = vector.broadcast %c2_i32 : i32 to vector<1x32xi32>
    %24 = arith.cmpi eq, %18, %23 : vector<1x32xi32>
    %c0_i32_6 = arith.constant 0 : i32
    %25 = arith.cmpi eq, %arg1, %c0_i32_6 : i32
    %c0_i32_7 = arith.constant 0 : i32
    %26 = arith.cmpi eq, %arg2, %c0_i32_7 : i32
    %27 = arith.andi %25, %26 : i1
    %28 = arith.extui %27 : i1 to i32
    %c0_i32_8 = arith.constant 0 : i32
    %29 = arith.cmpi ne, %28, %c0_i32_8 : i32
    scf.if %29 {
      %cst_16 = arith.constant -1.000000e+30 : f32
      %41 = vector.broadcast %cst_16 : f32 to vector<3x16x1xf32>
      %c0_17 = arith.constant 0 : index
      %c0_18 = arith.constant 0 : index
      %c0_19 = arith.constant 0 : index
      %42 = vector.load %arg9[%c0_17, %c0_18, %c0_19] : memref<3x16x1xf32, #tpu.memory_space<vmem>>, vector<3x16x1xf32>
      tpu.vector_store %arg9[%c0_17, %c0_18, %c0_19], %41 {strides = array<i32>} : memref<3x16x1xf32, #tpu.memory_space<vmem>>, vector<3x16x1xf32>,
      %cst_20 = arith.constant 0.000000e+00 : f32
      %43 = vector.broadcast %cst_20 : f32 to vector<3x16x1xf32>
      %c0_21 = arith.constant 0 : index
      %c0_22 = arith.constant 0 : index
      %c0_23 = arith.constant 0 : index
      %44 = vector.load %arg10[%c0_21, %c0_22, %c0_23] : memref<3x16x1xf32, #tpu.memory_space<vmem>>, vector<3x16x1xf32>
      tpu.vector_store %arg10[%c0_21, %c0_22, %c0_23], %43 {strides = array<i32>} : memref<3x16x1xf32, #tpu.memory_space<vmem>>, vector<3x16x1xf32>,
      %c0_24 = arith.constant 0 : index
      %c0_25 = arith.constant 0 : index
      %45 = vector.load %arg6[%c0_24, %c0_25] : memref<32x128xf32, #tpu.memory_space<vmem>>, vector<32x128xf32>
      %cst_26 = arith.constant dense<0.000000e+00> : vector<16x128xf32>
      %46 = tpu.matmul %0, %45, %cst_26 {dimension_numbers = #tpu.dot_dimension_numbers<[1], [0], [0], [1], [0, 0, 1, 1], [], []>} : vector<16x32xf32>, vector<32x128xf32>, vector<16x128xf32> -> vector<16x128xf32>
      %c0_27 = arith.constant 0 : index
      %c0_28 = arith.constant 0 : index
      %47 = vector.load %arg7[%c0_27, %c0_28] : memref<1x128xf32, #tpu.memory_space<vmem>>, vector<1x128xf32>
      %48 = vector.broadcast %47 : vector<1x128xf32> to vector<16x128xf32>
      %49 = arith.addf %46, %48 : vector<16x128xf32>
      %c0_29 = arith.constant 0 : index
      %c0_30 = arith.constant 0 : index
      %50 = vector.load %arg12[%c0_29, %c0_30] : memref<16x128xf32, #tpu.memory_space<vmem>>, vector<16x128xf32>
      tpu.vector_store %arg12[%c0_29, %c0_30], %49 {strides = array<i32>} : memref<16x128xf32, #tpu.memory_space<vmem>>, vector<16x128xf32>,
      %cst_31 = arith.constant dense<0xFF800000> : vector<16xf32>
      %51 = vector.multi_reduction <maximumf>, %49, %cst_31 [1] : vector<16x128xf32> to vector<16xf32>
      %52 = vector.shape_cast %51 : vector<16xf32> to vector<16x1xf32>
      %c0_32 = arith.constant 0 : index
      %c0_33 = arith.constant 0 : index
      %c0_34 = arith.constant 0 : index
      %53 = vector.load %arg9[%c0_32, %c0_33, %c0_34] : memref<3x16x1xf32, #tpu.memory_space<vmem>>, vector<1x16x1xf32>
      %54 = vector.shape_cast %53 : vector<1x16x1xf32> to vector<16x1xf32>
      %55 = vector.shape_cast %52 : vector<16x1xf32> to vector<1x16x1xf32>
      tpu.vector_store %arg9[%c0_32, %c0_33, %c0_34], %55 {strides = array<i32>} : memref<3x16x1xf32, #tpu.memory_space<vmem>>, vector<1x16x1xf32>,
      %56 = vector.broadcast %52 : vector<16x1xf32> to vector<16x128xf32>
      %57 = arith.subf %49, %56 : vector<16x128xf32>
      %58 = math.exp %57 : vector<16x128xf32>
      %cst_35 = arith.constant dense<0.000000e+00> : vector<16xf32>
      %59 = vector.multi_reduction <add>, %58, %cst_35 [1] : vector<16x128xf32> to vector<16xf32>
      %60 = vector.shape_cast %59 : vector<16xf32> to vector<16x1xf32>
      %c0_36 = arith.constant 0 : index
      %c0_37 = arith.constant 0 : index
      %c0_38 = arith.constant 0 : index
      %61 = vector.load %arg10[%c0_36, %c0_37, %c0_38] : memref<3x16x1xf32, #tpu.memory_space<vmem>>, vector<1x16x1xf32>
      %62 = vector.shape_cast %61 : vector<1x16x1xf32> to vector<16x1xf32>
      %63 = vector.shape_cast %60 : vector<16x1xf32> to vector<1x16x1xf32>
      tpu.vector_store %arg10[%c0_36, %c0_37, %c0_38], %63 {strides = array<i32>} : memref<3x16x1xf32, #tpu.memory_space<vmem>>, vector<1x16x1xf32>,
    } else {
    }
    %c0_i32_9 = arith.constant 0 : i32
    %30 = arith.cmpi eq, %arg1, %c0_i32_9 : i32
    %31 = arith.extui %30 : i1 to i32
    %c0_i32_10 = arith.constant 0 : i32
    %32 = arith.cmpi ne, %31, %c0_i32_10 : i32
    scf.if %32 {
      %c0_16 = arith.constant 0 : index
      %c0_17 = arith.constant 0 : index
      %c0_18 = arith.constant 0 : index
      %41 = vector.load %arg9[%c0_16, %c0_17, %c0_18] : memref<3x16x1xf32, #tpu.memory_space<vmem>>, vector<1x16x1xf32>
      %42 = vector.shape_cast %41 : vector<1x16x1xf32> to vector<16x1xf32>
      %c1 = arith.constant 1 : index
      %c0_19 = arith.constant 0 : index
      %c0_20 = arith.constant 0 : index
      %43 = vector.load %arg9[%c1, %c0_19, %c0_20] : memref<3x16x1xf32, #tpu.memory_space<vmem>>, vector<1x16x1xf32>
      %44 = vector.shape_cast %43 : vector<1x16x1xf32> to vector<16x1xf32>
      %c2 = arith.constant 2 : index
      %c0_21 = arith.constant 0 : index
      %c0_22 = arith.constant 0 : index
      %45 = vector.load %arg9[%c2, %c0_21, %c0_22] : memref<3x16x1xf32, #tpu.memory_space<vmem>>, vector<1x16x1xf32>
      %46 = vector.shape_cast %45 : vector<1x16x1xf32> to vector<16x1xf32>
      %c0_23 = arith.constant 0 : index
      %c0_24 = arith.constant 0 : index
      %c0_25 = arith.constant 0 : index
      %47 = vector.load %arg10[%c0_23, %c0_24, %c0_25] : memref<3x16x1xf32, #tpu.memory_space<vmem>>, vector<1x16x1xf32>
      %48 = vector.shape_cast %47 : vector<1x16x1xf32> to vector<16x1xf32>
      %c1_26 = arith.constant 1 : index
      %c0_27 = arith.constant 0 : index
      %c0_28 = arith.constant 0 : index
      %49 = vector.load %arg10[%c1_26, %c0_27, %c0_28] : memref<3x16x1xf32, #tpu.memory_space<vmem>>, vector<1x16x1xf32>
      %50 = vector.shape_cast %49 : vector<1x16x1xf32> to vector<16x1xf32>
      %c2_29 = arith.constant 2 : index
      %c0_30 = arith.constant 0 : index
      %c0_31 = arith.constant 0 : index
      %51 = vector.load %arg10[%c2_29, %c0_30, %c0_31] : memref<3x16x1xf32, #tpu.memory_space<vmem>>, vector<1x16x1xf32>
      %52 = vector.shape_cast %51 : vector<1x16x1xf32> to vector<16x1xf32>
      %cst_32 = arith.constant -1.000000e+30 : f32
      %53 = vector.shape_cast %20 : vector<1x32xi1> to vector<1x32xi1>
      %54 = vector.broadcast %53 : vector<1x32xi1> to vector<16x32xi1>
      %55 = vector.broadcast %cst_32 : f32 to vector<16x32xf32>
      %56 = arith.select %54, %5, %55 : vector<16x32xi1>, vector<16x32xf32>
      %cst_33 = arith.constant dense<0xFF800000> : vector<16xf32>
      %57 = vector.multi_reduction <maximumf>, %56, %cst_33 [1] : vector<16x32xf32> to vector<16xf32>
      %58 = vector.shape_cast %57 : vector<16xf32> to vector<16x1xf32>
      %59 = arith.maximumf %42, %58 : vector<16x1xf32>
      %cst_34 = arith.constant -1.000000e+30 : f32
      %60 = vector.shape_cast %22 : vector<1x32xi1> to vector<1x32xi1>
      %61 = vector.broadcast %60 : vector<1x32xi1> to vector<16x32xi1>
      %62 = vector.broadcast %cst_34 : f32 to vector<16x32xf32>
      %63 = arith.select %61, %5, %62 : vector<16x32xi1>, vector<16x32xf32>
      %cst_35 = arith.constant dense<0xFF800000> : vector<16xf32>
      %64 = vector.multi_reduction <maximumf>, %63, %cst_35 [1] : vector<16x32xf32> to vector<16xf32>
      %65 = vector.shape_cast %64 : vector<16xf32> to vector<16x1xf32>
      %66 = arith.maximumf %44, %65 : vector<16x1xf32>
      %cst_36 = arith.constant -1.000000e+30 : f32
      %67 = vector.shape_cast %24 : vector<1x32xi1> to vector<1x32xi1>
      %68 = vector.broadcast %67 : vector<1x32xi1> to vector<16x32xi1>
      %69 = vector.broadcast %cst_36 : f32 to vector<16x32xf32>
      %70 = arith.select %68, %5, %69 : vector<16x32xi1>, vector<16x32xf32>
      %cst_37 = arith.constant dense<0xFF800000> : vector<16xf32>
      %71 = vector.multi_reduction <maximumf>, %70, %cst_37 [1] : vector<16x32xf32> to vector<16xf32>
      %72 = vector.shape_cast %71 : vector<16xf32> to vector<16x1xf32>
      %73 = arith.maximumf %46, %72 : vector<16x1xf32>
      %cst_38 = arith.constant 0.000000e+00 : f32
      %74 = vector.shape_cast %20 : vector<1x32xi1> to vector<1x32xi1>
      %75 = vector.broadcast %74 : vector<1x32xi1> to vector<16x32xi1>
      %76 = vector.shape_cast %59 : vector<16x1xf32> to vector<16x1xf32>
      %77 = vector.broadcast %76 : vector<16x1xf32> to vector<16x32xf32>
      %78 = vector.broadcast %cst_38 : f32 to vector<16x32xf32>
      %79 = arith.select %75, %77, %78 : vector<16x32xi1>, vector<16x32xf32>
      %80 = vector.shape_cast %22 : vector<1x32xi1> to vector<1x32xi1>
      %81 = vector.broadcast %80 : vector<1x32xi1> to vector<16x32xi1>
      %82 = vector.shape_cast %66 : vector<16x1xf32> to vector<16x1xf32>
      %83 = vector.broadcast %82 : vector<16x1xf32> to vector<16x32xf32>
      %84 = arith.select %81, %83, %79 : vector<16x32xi1>, vector<16x32xf32>
      %85 = vector.shape_cast %24 : vector<1x32xi1> to vector<1x32xi1>
      %86 = vector.broadcast %85 : vector<1x32xi1> to vector<16x32xi1>
      %87 = vector.shape_cast %73 : vector<16x1xf32> to vector<16x1xf32>
      %88 = vector.broadcast %87 : vector<16x1xf32> to vector<16x32xf32>
      %89 = arith.select %86, %88, %84 : vector<16x32xi1>, vector<16x32xf32>
      %90 = arith.subf %5, %89 : vector<16x32xf32>
      %91 = math.exp %90 : vector<16x32xf32>
      %cst_39 = arith.constant 0.000000e+00 : f32
      %92 = vector.shape_cast %20 : vector<1x32xi1> to vector<1x32xi1>
      %93 = vector.broadcast %92 : vector<1x32xi1> to vector<16x32xi1>
      %94 = vector.broadcast %cst_39 : f32 to vector<16x32xf32>
      %95 = arith.select %93, %91, %94 : vector<16x32xi1>, vector<16x32xf32>
      %cst_40 = arith.constant dense<0.000000e+00> : vector<16xf32>
      %96 = vector.multi_reduction <add>, %95, %cst_40 [1] : vector<16x32xf32> to vector<16xf32>
      %97 = vector.shape_cast %96 : vector<16xf32> to vector<16x1xf32>
      %c0_41 = arith.constant 0 : index
      %c0_42 = arith.constant 0 : index
      %c0_43 = arith.constant 0 : index
      %98 = vector.load %arg9[%c0_41, %c0_42, %c0_43] : memref<3x16x1xf32, #tpu.memory_space<vmem>>, vector<1x16x1xf32>
      %99 = vector.shape_cast %98 : vector<1x16x1xf32> to vector<16x1xf32>
      %100 = vector.shape_cast %59 : vector<16x1xf32> to vector<1x16x1xf32>
      tpu.vector_store %arg9[%c0_41, %c0_42, %c0_43], %100 {strides = array<i32>} : memref<3x16x1xf32, #tpu.memory_space<vmem>>, vector<1x16x1xf32>,
      %101 = arith.subf %42, %59 : vector<16x1xf32>
      %102 = math.exp %101 : vector<16x1xf32>
      %103 = arith.mulf %48, %102 : vector<16x1xf32>
      %104 = arith.addf %103, %97 : vector<16x1xf32>
      %c0_44 = arith.constant 0 : index
      %c0_45 = arith.constant 0 : index
      %c0_46 = arith.constant 0 : index
      %105 = vector.load %arg10[%c0_44, %c0_45, %c0_46] : memref<3x16x1xf32, #tpu.memory_space<vmem>>, vector<1x16x1xf32>
      %106 = vector.shape_cast %105 : vector<1x16x1xf32> to vector<16x1xf32>
      %107 = vector.shape_cast %104 : vector<16x1xf32> to vector<1x16x1xf32>
      tpu.vector_store %arg10[%c0_44, %c0_45, %c0_46], %107 {strides = array<i32>} : memref<3x16x1xf32, #tpu.memory_space<vmem>>, vector<1x16x1xf32>,
      %cst_47 = arith.constant 0.000000e+00 : f32
      %108 = vector.shape_cast %22 : vector<1x32xi1> to vector<1x32xi1>
      %109 = vector.broadcast %108 : vector<1x32xi1> to vector<16x32xi1>
      %110 = vector.broadcast %cst_47 : f32 to vector<16x32xf32>
      %111 = arith.select %109, %91, %110 : vector<16x32xi1>, vector<16x32xf32>
      %cst_48 = arith.constant dense<0.000000e+00> : vector<16xf32>
      %112 = vector.multi_reduction <add>, %111, %cst_48 [1] : vector<16x32xf32> to vector<16xf32>
      %113 = vector.shape_cast %112 : vector<16xf32> to vector<16x1xf32>
      %c1_49 = arith.constant 1 : index
      %c0_50 = arith.constant 0 : index
      %c0_51 = arith.constant 0 : index
      %114 = vector.load %arg9[%c1_49, %c0_50, %c0_51] : memref<3x16x1xf32, #tpu.memory_space<vmem>>, vector<1x16x1xf32>
      %115 = vector.shape_cast %114 : vector<1x16x1xf32> to vector<16x1xf32>
      %116 = vector.shape_cast %66 : vector<16x1xf32> to vector<1x16x1xf32>
      tpu.vector_store %arg9[%c1_49, %c0_50, %c0_51], %116 {strides = array<i32>} : memref<3x16x1xf32, #tpu.memory_space<vmem>>, vector<1x16x1xf32>,
      %117 = arith.subf %44, %66 : vector<16x1xf32>
      %118 = math.exp %117 : vector<16x1xf32>
      %119 = arith.mulf %50, %118 : vector<16x1xf32>
      %120 = arith.addf %119, %113 : vector<16x1xf32>
      %c1_52 = arith.constant 1 : index
      %c0_53 = arith.constant 0 : index
      %c0_54 = arith.constant 0 : index
      %121 = vector.load %arg10[%c1_52, %c0_53, %c0_54] : memref<3x16x1xf32, #tpu.memory_space<vmem>>, vector<1x16x1xf32>
      %122 = vector.shape_cast %121 : vector<1x16x1xf32> to vector<16x1xf32>
      %123 = vector.shape_cast %120 : vector<16x1xf32> to vector<1x16x1xf32>
      tpu.vector_store %arg10[%c1_52, %c0_53, %c0_54], %123 {strides = array<i32>} : memref<3x16x1xf32, #tpu.memory_space<vmem>>, vector<1x16x1xf32>,
      %cst_55 = arith.constant 0.000000e+00 : f32
      %124 = vector.shape_cast %24 : vector<1x32xi1> to vector<1x32xi1>
      %125 = vector.broadcast %124 : vector<1x32xi1> to vector<16x32xi1>
      %126 = vector.broadcast %cst_55 : f32 to vector<16x32xf32>
      %127 = arith.select %125, %91, %126 : vector<16x32xi1>, vector<16x32xf32>
      %cst_56 = arith.constant dense<0.000000e+00> : vector<16xf32>
      %128 = vector.multi_reduction <add>, %127, %cst_56 [1] : vector<16x32xf32> to vector<16xf32>
      %129 = vector.shape_cast %128 : vector<16xf32> to vector<16x1xf32>
      %c2_57 = arith.constant 2 : index
      %c0_58 = arith.constant 0 : index
      %c0_59 = arith.constant 0 : index
      %130 = vector.load %arg9[%c2_57, %c0_58, %c0_59] : memref<3x16x1xf32, #tpu.memory_space<vmem>>, vector<1x16x1xf32>
      %131 = vector.shape_cast %130 : vector<1x16x1xf32> to vector<16x1xf32>
      %132 = vector.shape_cast %73 : vector<16x1xf32> to vector<1x16x1xf32>
      tpu.vector_store %arg9[%c2_57, %c0_58, %c0_59], %132 {strides = array<i32>} : memref<3x16x1xf32, #tpu.memory_space<vmem>>, vector<1x16x1xf32>,
      %133 = arith.subf %46, %73 : vector<16x1xf32>
      %134 = math.exp %133 : vector<16x1xf32>
      %135 = arith.mulf %52, %134 : vector<16x1xf32>
      %136 = arith.addf %135, %129 : vector<16x1xf32>
      %c2_60 = arith.constant 2 : index
      %c0_61 = arith.constant 0 : index
      %c0_62 = arith.constant 0 : index
      %137 = vector.load %arg10[%c2_60, %c0_61, %c0_62] : memref<3x16x1xf32, #tpu.memory_space<vmem>>, vector<1x16x1xf32>
      %138 = vector.shape_cast %137 : vector<1x16x1xf32> to vector<16x1xf32>
      %139 = vector.shape_cast %136 : vector<16x1xf32> to vector<1x16x1xf32>
      tpu.vector_store %arg10[%c2_60, %c0_61, %c0_62], %139 {strides = array<i32>} : memref<3x16x1xf32, #tpu.memory_space<vmem>>, vector<1x16x1xf32>,
    } else {
    }
    %c1_i32_11 = arith.constant 1 : i32
    %33 = arith.cmpi eq, %arg1, %c1_i32_11 : i32
    %c0_i32_12 = arith.constant 0 : i32
    %34 = arith.cmpi eq, %arg2, %c0_i32_12 : i32
    %35 = arith.andi %33, %34 : i1
    %36 = arith.extui %35 : i1 to i32
    %c0_i32_13 = arith.constant 0 : i32
    %37 = arith.cmpi ne, %36, %c0_i32_13 : i32
    scf.if %37 {
      %c0_16 = arith.constant 0 : index
      %c0_17 = arith.constant 0 : index
      %c0_18 = arith.constant 0 : index
      %41 = vector.load %arg9[%c0_16, %c0_17, %c0_18] : memref<3x16x1xf32, #tpu.memory_space<vmem>>, vector<1x16x1xf32>
      %42 = vector.shape_cast %41 : vector<1x16x1xf32> to vector<16x1xf32>
      %c0_19 = arith.constant 0 : index
      %c0_20 = arith.constant 0 : index
      %c0_21 = arith.constant 0 : index
      %43 = vector.load %arg10[%c0_19, %c0_20, %c0_21] : memref<3x16x1xf32, #tpu.memory_space<vmem>>, vector<1x16x1xf32>
      %44 = vector.shape_cast %43 : vector<1x16x1xf32> to vector<16x1xf32>
      %45 = math.log %44 : vector<16x1xf32>
      %46 = arith.addf %42, %45 : vector<16x1xf32>
      %cst_22 = arith.constant 0.000000e+00 : f32
      %47 = vector.broadcast %cst_22 : f32 to vector<16x1xf32>
      %48 = arith.subf %47, %46 : vector<16x1xf32>
      %c0_23 = arith.constant 0 : index
      %c0_24 = arith.constant 0 : index
      %c0_25 = arith.constant 0 : index
      %49 = vector.load %arg11[%c0_23, %c0_24, %c0_25] : memref<3x16x1xf32, #tpu.memory_space<vmem>>, vector<1x16x1xf32>
      %50 = vector.shape_cast %49 : vector<1x16x1xf32> to vector<16x1xf32>
      %51 = vector.shape_cast %48 : vector<16x1xf32> to vector<1x16x1xf32>
      tpu.vector_store %arg11[%c0_23, %c0_24, %c0_25], %51 {strides = array<i32>} : memref<3x16x1xf32, #tpu.memory_space<vmem>>, vector<1x16x1xf32>,
      %c0_26 = arith.constant 0 : index
      %c0_27 = arith.constant 0 : index
      %52 = vector.load %arg12[%c0_26, %c0_27] : memref<16x128xf32, #tpu.memory_space<vmem>>, vector<16x128xf32>
      %53 = vector.extract_strided_slice %52 {offsets = [0, 0], sizes = [16, 1], strides = [1, 1]} : vector<16x128xf32> to vector<16x1xf32>
      %54 = arith.subf %53, %46 : vector<16x1xf32>
      %c1 = arith.constant 1 : index
      %c0_28 = arith.constant 0 : index
      %c0_29 = arith.constant 0 : index
      %55 = vector.load %arg9[%c1, %c0_28, %c0_29] : memref<3x16x1xf32, #tpu.memory_space<vmem>>, vector<1x16x1xf32>
      %56 = vector.shape_cast %55 : vector<1x16x1xf32> to vector<16x1xf32>
      %c1_30 = arith.constant 1 : index
      %c0_31 = arith.constant 0 : index
      %c0_32 = arith.constant 0 : index
      %57 = vector.load %arg10[%c1_30, %c0_31, %c0_32] : memref<3x16x1xf32, #tpu.memory_space<vmem>>, vector<1x16x1xf32>
      %58 = vector.shape_cast %57 : vector<1x16x1xf32> to vector<16x1xf32>
      %59 = math.log %58 : vector<16x1xf32>
      %60 = arith.addf %56, %59 : vector<16x1xf32>
      %61 = arith.subf %54, %60 : vector<16x1xf32>
      %c1_33 = arith.constant 1 : index
      %c0_34 = arith.constant 0 : index
      %c0_35 = arith.constant 0 : index
      %62 = vector.load %arg11[%c1_33, %c0_34, %c0_35] : memref<3x16x1xf32, #tpu.memory_space<vmem>>, vector<1x16x1xf32>
      %63 = vector.shape_cast %62 : vector<1x16x1xf32> to vector<16x1xf32>
      %64 = vector.shape_cast %61 : vector<16x1xf32> to vector<1x16x1xf32>
      tpu.vector_store %arg11[%c1_33, %c0_34, %c0_35], %64 {strides = array<i32>} : memref<3x16x1xf32, #tpu.memory_space<vmem>>, vector<1x16x1xf32>,
      %65 = vector.extract_strided_slice %52 {offsets = [0, 1], sizes = [16, 1], strides = [1, 1]} : vector<16x128xf32> to vector<16x1xf32>
      %66 = arith.subf %65, %46 : vector<16x1xf32>
      %c2 = arith.constant 2 : index
      %c0_36 = arith.constant 0 : index
      %c0_37 = arith.constant 0 : index
      %67 = vector.load %arg9[%c2, %c0_36, %c0_37] : memref<3x16x1xf32, #tpu.memory_space<vmem>>, vector<1x16x1xf32>
      %68 = vector.shape_cast %67 : vector<1x16x1xf32> to vector<16x1xf32>
      %c2_38 = arith.constant 2 : index
      %c0_39 = arith.constant 0 : index
      %c0_40 = arith.constant 0 : index
      %69 = vector.load %arg10[%c2_38, %c0_39, %c0_40] : memref<3x16x1xf32, #tpu.memory_space<vmem>>, vector<1x16x1xf32>
      %70 = vector.shape_cast %69 : vector<1x16x1xf32> to vector<16x1xf32>
      %71 = math.log %70 : vector<16x1xf32>
      %72 = arith.addf %68, %71 : vector<16x1xf32>
      %73 = arith.subf %66, %72 : vector<16x1xf32>
      %c2_41 = arith.constant 2 : index
      %c0_42 = arith.constant 0 : index
      %c0_43 = arith.constant 0 : index
      %74 = vector.load %arg11[%c2_41, %c0_42, %c0_43] : memref<3x16x1xf32, #tpu.memory_space<vmem>>, vector<1x16x1xf32>
      %75 = vector.shape_cast %74 : vector<1x16x1xf32> to vector<16x1xf32>
      %76 = vector.shape_cast %73 : vector<16x1xf32> to vector<1x16x1xf32>
      tpu.vector_store %arg11[%c2_41, %c0_42, %c0_43], %76 {strides = array<i32>} : memref<3x16x1xf32, #tpu.memory_space<vmem>>, vector<1x16x1xf32>,
    } else {
    }
    %c1_i32_14 = arith.constant 1 : i32
    %38 = arith.cmpi eq, %arg1, %c1_i32_14 : i32
    %39 = arith.extui %38 : i1 to i32
    %c0_i32_15 = arith.constant 0 : i32
    %40 = arith.cmpi ne, %39, %c0_i32_15 : i32
    scf.if %40 {
      %c0_16 = arith.constant 0 : index
      %c0_17 = arith.constant 0 : index
      %c0_18 = arith.constant 0 : index
      %41 = vector.load %arg11[%c0_16, %c0_17, %c0_18] : memref<3x16x1xf32, #tpu.memory_space<vmem>>, vector<1x16x1xf32>
      %42 = vector.shape_cast %41 : vector<1x16x1xf32> to vector<16x1xf32>
      %cst_19 = arith.constant 0.000000e+00 : f32
      %43 = vector.shape_cast %20 : vector<1x32xi1> to vector<1x32xi1>
      %44 = vector.broadcast %43 : vector<1x32xi1> to vector<16x32xi1>
      %45 = vector.shape_cast %42 : vector<16x1xf32> to vector<16x1xf32>
      %46 = vector.broadcast %45 : vector<16x1xf32> to vector<16x32xf32>
      %47 = vector.broadcast %cst_19 : f32 to vector<16x32xf32>
      %48 = arith.select %44, %46, %47 : vector<16x32xi1>, vector<16x32xf32>
      %c1 = arith.constant 1 : index
      %c0_20 = arith.constant 0 : index
      %c0_21 = arith.constant 0 : index
      %49 = vector.load %arg11[%c1, %c0_20, %c0_21] : memref<3x16x1xf32, #tpu.memory_space<vmem>>, vector<1x16x1xf32>
      %50 = vector.shape_cast %49 : vector<1x16x1xf32> to vector<16x1xf32>
      %51 = vector.shape_cast %22 : vector<1x32xi1> to vector<1x32xi1>
      %52 = vector.broadcast %51 : vector<1x32xi1> to vector<16x32xi1>
      %53 = vector.shape_cast %50 : vector<16x1xf32> to vector<16x1xf32>
      %54 = vector.broadcast %53 : vector<16x1xf32> to vector<16x32xf32>
      %55 = arith.select %52, %54, %48 : vector<16x32xi1>, vector<16x32xf32>
      %c2 = arith.constant 2 : index
      %c0_22 = arith.constant 0 : index
      %c0_23 = arith.constant 0 : index
      %56 = vector.load %arg11[%c2, %c0_22, %c0_23] : memref<3x16x1xf32, #tpu.memory_space<vmem>>, vector<1x16x1xf32>
      %57 = vector.shape_cast %56 : vector<1x16x1xf32> to vector<16x1xf32>
      %58 = vector.shape_cast %24 : vector<1x32xi1> to vector<1x32xi1>
      %59 = vector.broadcast %58 : vector<1x32xi1> to vector<16x32xi1>
      %60 = vector.shape_cast %57 : vector<16x1xf32> to vector<16x1xf32>
      %61 = vector.broadcast %60 : vector<16x1xf32> to vector<16x32xf32>
      %62 = arith.select %59, %61, %55 : vector<16x32xi1>, vector<16x32xf32>
      %63 = arith.addf %5, %62 : vector<16x32xf32>
      %c0_24 = arith.constant 0 : index
      %c0_25 = arith.constant 0 : index
      %64 = vector.load %arg8[%c0_24, %c0_25] : memref<16x32xf32, #tpu.memory_space<vmem>>, vector<16x32xf32>
      tpu.vector_store %arg8[%c0_24, %c0_25], %63 {strides = array<i32>} : memref<16x32xf32, #tpu.memory_space<vmem>>, vector<16x32xf32>,
    } else {
    }
    return
  }
  func.func @transform_0(%arg0: i32, %arg1: i32, %arg2: i32) -> (i32, i32) {
    %c0_i32 = arith.constant 0 : i32
    %c0_i32_0 = arith.constant 0 : i32
    return %arg0, %c0_i32 : i32, i32
  }
  func.func @transform_1(%arg0: i32, %arg1: i32, %arg2: i32) -> (i32, i32) {
    %c0_i32 = arith.constant 0 : i32
    %c0_i32_0 = arith.constant 0 : i32
    return %c0_i32, %arg2 : i32, i32
  }
  func.func @transform_2(%arg0: i32, %arg1: i32, %arg2: i32) -> (i32, i32) {
    %c0_i32 = arith.constant 0 : i32
    %c0_i32_0 = arith.constant 0 : i32
    return %c0_i32, %arg2 : i32, i32
  }
  func.func @transform_3(%arg0: i32, %arg1: i32, %arg2: i32) -> (i32, i32) {
    %c0_i32 = arith.constant 0 : i32
    %c0_i32_0 = arith.constant 0 : i32
    %c0_i32_1 = arith.constant 0 : i32
    return %c0_i32, %c0_i32_0 : i32, i32
  }
  func.func @transform_4(%arg0: i32, %arg1: i32, %arg2: i32) -> (i32, i32) {
    %c0_i32 = arith.constant 0 : i32
    %c0_i32_0 = arith.constant 0 : i32
    %c0_i32_1 = arith.constant 0 : i32
    return %c0_i32, %c0_i32_0 : i32, i32
  }
  func.func @transform_5(%arg0: i32, %arg1: i32, %arg2: i32) -> (i32, i32) {
    %0 = arith.muli %arg2, %arg1 : i32
    %c0_i32 = arith.constant 0 : i32
    return %arg0, %0 : i32, i32
  }
}

</mosaic_0001>

<bundles_post_ra>
// kernel: tpu_custom_call.1
= control target key start
LH: loop header
LB: loop body
LE: loop exit
PB: predicated region body
PF: predicated region fallthrough
CT: control target
= control target key end

     0   :  { %10 = vsyncpa [#allocation7], 0  ;;  %s1611_s0 = inlined_call_operand.hbm [shape: f32[16,32], index: 0, kind: input, shape index: {}]   ;;  %s1612_s1 = inlined_call_operand.hbm [shape: f32[32,32], index: 1, kind: input, shape index: {}]   ;;  %s1613_s2 = inlined_call_operand.vmem [shape: f32[1,32], index: 2, kind: input, shape index: {}]   ;;  %s1614_s3 = inlined_call_operand.hbm [shape: f32[32,128], index: 3, kind: input, shape index: {}]   ;;  %s1615_s4 = inlined_call_operand.vmem [shape: f32[1,128], index: 4, kind: input, shape index: {}]   ;;  %s1616_s5 = inlined_call_operand.hbm [shape: f32[16,32], index: 5, kind: output, shape index: {}]  }
   0x1   :  { %11 = vsyncpa [#allocation10], 0 }
   0x2   :  { %12 = vsyncpa [#allocation8], 0 }
   0x3   :  { %14 = vsyncpa [#allocation8 + $0x1], 0  ;;  %s1324_s18 = smov 0   ;;  %s1326_s19 = smov 0  }
   0x4   :  { %s1328_s20 = smov 0  }
   0x5 LB: > { %s966_s21 = sadd.s32 4294967295, %s1277_s20   ;;  %s967_s22 = sadd.s32 4294967294, %s1277_s20   ;;  %s1277_s20 = sphi %s1328_s20, %s20_s20   ;;  %s1273_s19 = sphi %s1326_s19, %s1623_s19   ;;  %s1269_s18 = sphi %s1324_s18, %s1622_s18  }
   0x6   : > { %p968_p0 = scmp.ge.s32.totalorder %s1277_s20, 1  ;;  %p194_p1 = scmp.lt.s32.totalorder %s1277_s20, 3 }
   0x7   : > { %p1345_p2 = scmp.eq.s32.totalorder %s966_s21, 0  ;;  %s1279_s25 = smov [#allocation9]  }
   0x8   : > { %p1349_p3 = pnand %p968_p0, %p194_p1  ;;  %s224_s26 = sshll.u32 %s1279_s25, 4  ;;  %s225_s26 = int_to_ptr.vmem [resolvable:$true] %s224_s26 }
   0x9   : > { %s35_s28 = sadd.s32 1, %s1273_s19  ;;  %s1152_s30 = scalar_lea.vmem %s225_s26, 512 }
   0xa   : > { %p1043_p4 = pneg %p1349_p3  ;;  %p1362_p6 = scmp.ge.s32.totalorder %s35_s28, 2 }
   0xb   : > { %p1153_p8 = scmp.ne.s32.totalorder %s225_s26, %s1152_s30  ;;  %p1160_p11 = scmp.lt.s32.totalorder %s225_s26, %s225_s26 }
   0xc   : > { %p1357_p5 = pnand %p1345_p2, %p1043_p4  ;;  %p1161_p12 = scmp.lt.s32.totalorder %s1152_s30, %s1152_s30 }
   0xe   : > { %p1143_p7 = pneg %p1357_p5  ;;  %p1162_p13 = por %p1161_p12, %p1160_p11 }
  0x10   : > { %p1155_p9 = pnand %p1153_p8, %p1143_p7 }
  0x12   : > { %p1156_p10 = pneg %p1155_p9 }
  0x14   : > { %p1163_p0 = pnand %p1162_p13, %p1156_p10 }
  0x16   : > { %1166 = shalt.err (!%p1163_p0)
}
  0x17   : > { %s1280_s6 = smov 128   ;;  %s1281_s7 = smov 8  }
  0x18   : > { %1049 = dma.hbm_to_vmem [thread:$0]  (!%p1357_p5), %s1612_s1, 512, %s225_s26, [#allocation10], %s1280_s6, %s1280_s6, %s1281_s7  }
  0x19   : > { %s1625_s28 = smov (%p1362_p6, %s35_s28), 0  ;;  %s1282_s10 = smov [#allocation6]  }
  0x1a   : > { %s209_s11 = sshll.u32 %s1282_s10, 4  ;;  %s1283_s12 = smov [#allocation11]   ;;  %s210_s11 = int_to_ptr.vmem [resolvable:$true] %s209_s11 }
  0x1b   : > { %s243_s13 = sshll.u32 %s1283_s12, 4  ;;  %s1178_s14 = scalar_lea.vmem %s210_s11, 256  ;;  %s244_s13 = int_to_ptr.vmem [resolvable:$true] %s243_s13 }
  0x1c   : > { %p1179_p1 = scmp.ne.s32.totalorder %s210_s11, %s1178_s14  ;;  %p1186_p9 = scmp.lt.s32.totalorder %s210_s11, %s210_s11 }
  0x1d   : > { %p1187_p10 = scmp.lt.s32.totalorder %s1178_s14, %s1178_s14 }
  0x1e   : > { %p1181_p4 = pnand %p1179_p1, %p1143_p7 }
  0x1f   : > { %p1188_p11 = por %p1187_p10, %p1186_p9 }
  0x20   : > { %p1182_p8 = pneg %p1181_p4 }
  0x22   : > { %p1189_p12 = pnand %p1188_p11, %p1182_p8 }
  0x24   : > { %1192 = shalt.err (!%p1189_p12)
}
  0x25   : > { %1046 = dma.hbm_to_vmem [thread:$0]  (!%p1357_p5), %s1611_s0, 256, %s210_s11, [#allocation7], %s1280_s6, %s1280_s6, %s1281_s7  }
  0x26   : > { %s1204_s17 = scalar_lea.vmem %s244_s13, 512  ;;  %p1212_p1 = scmp.lt.s32.totalorder %s244_s13, %s244_s13 }
  0x27   : > { %p1205_p6 = scmp.ne.s32.totalorder %s244_s13, %s1204_s17  ;;  %p1213_p4 = scmp.lt.s32.totalorder %s1204_s17, %s1204_s17 }
  0x29   : > { %p1207_p13 = pnand %p1205_p6, %p1143_p7  ;;  %p1214_p8 = por %p1213_p4, %p1212_p1 }
  0x2b   : > { %p1208_p0 = pneg %p1207_p13 }
  0x2d   : > { %p1215_p9 = pnand %p1214_p8, %p1208_p0 }
  0x2f   : > { %1218 = shalt.err (!%p1215_p9)
}
  0x30   : > { %1052 = dma.hbm_to_vmem [thread:$0]  (!%p1357_p5), %s1614_s3, 512, %s244_s13, [#allocation10], %s1280_s6, %s1280_s6, %s1281_s7  }
  0x31   : > { %262 = sbr.rel (%p1349_p3) target bundleno = 1451 (0x5ab), region = 40 }
  0x36   : > { %1256 = dma.done.wait (%p1345_p2), [#allocation7], 256  }
  0x37   : > { %1258 = vsyncadd (%p1345_p2), [#allocation7], 4294967040 }
  0x38   : > { %1260 = dma.done.wait (%p1345_p2), [#allocation10], 1024  }
  0x39   : > { %1262 = vsyncadd (%p1345_p2), [#allocation10], 4294966272  ;;  %vm315_vm0 = vcmask 261120   ;;  %v307_v0 = vld [vmem:[#allocation9 + $0x18] sm:$0xff]  ;;  %v306_v1 = vld [vmem:[#allocation9 + $0x10] sm:$0xff]  ;;  %v398_v6 = vlaneseq  ;;  %v1284_v8 = vmov 0  }
  0x3a   : > { %1005 = vmatprep.subr.mxu0 %v307_v0  ;;  %v302_v2 = vld [vmem:[#allocation6] sm:$0xff]  ;;  %v305_v3 = vld [vmem:[#allocation9 + $0x8] sm:$0xff]  ;;  %v304_v4 = vld [vmem:[#allocation9] sm:$0xff]  ;;  %p410_p2 = scmp.eq.s32.totalorder %s1269_s18, 0 }
  0x3b   : > { %1006 = vmatpush3.msra.mxu0 %v307_v0  ;;  %1013 = vmatprep.mubr.msk.f32.mxu0 %vm315_vm0, %v302_v2  ;;  %v303_v5 = vld [vmem:[#allocation6 + $0x8] sm:$0xff]  ;;  %v399_v7 = vand.u32 127, %v398_v6  ;;  %v977_v12 = vld [vmem:[%s1613_s2] ss:$0 sm:$0xff]  ;;  %v430_v19 = vld [vmem:[#allocation11 + $0x8] sm:$0xff] (%p410_p2)  ;;  %vm416_vm6 = vcmask (%p410_p2), 7168  }
  0x3c   : > { %1007 = vmatprep.subr.mxu0 %v306_v1  ;;  %v432_v17 = vld [vmem:[#allocation11 + $0x18] sm:$0xff] (%p410_p2)  ;;  %v431_v18 = vld [vmem:[#allocation11 + $0x10] sm:$0xff] (%p410_p2)  ;;  %v429_v20 = vld [vmem:[#allocation11] sm:$0xff] (%p410_p2)  ;;  %v1285_v26 = vmov (%p410_p2), -1e+30   ;;  %v1286_v35 = vmov (%p410_p2), 0.0  }
  0x3d   : > { %1008 = vmatpush3.msra.mxu0 %v306_v1  ;;  %vm402_vm1 = vcmp.ge.s32.totalorder %v399_v7, 8  ;;  %vm404_vm2 = vcmp.ge.s32.totalorder %v399_v7, 16  ;;  %v981_v21 = vld [vmem:[%s1615_s4] ss:$0 sm:$0xff] (%p410_p2)  ;;  %417 = vst.msk [vmem:[#allocation2] sm:$0xff] (%p410_p2), %vm416_vm6, %v1285_v26  ;;  %419 = vst.msk [vmem:[#allocation2 + $0x10] sm:$0xff] (%p410_p2), %vm416_vm6, %v1285_v26 }
  0x3e   : > { %1009 = vmatprep.subr.mxu0 %v305_v3  ;;  %v403_v9 = vsel %vm402_vm1, 1, %v1284_v8  ;;  %v405_v10 = vsel %vm404_vm2, 1, %v1284_v8  ;;  %420 = vst.msk [vmem:[#allocation2 + $0x18] sm:$0xff] (%p410_p2), %vm416_vm6, %v1285_v26  ;;  %421 = vst.msk [vmem:[#allocation2 + $0x20] sm:$0xff] (%p410_p2), %vm416_vm6, %v1285_v26 }
  0x3f   : > { %1010 = vmatpush3.msra.mxu0 %v305_v3  ;;  %v1417_v11 = vadd.s32 %v405_v10, %v403_v9  ;;  %422 = vst.msk [vmem:[#allocation2 + $0x28] sm:$0xff] (%p410_p2), %vm416_vm6, %v1285_v26  ;;  %418 = vst.msk [vmem:[#allocation2 + $0x8] sm:$0xff] (%p410_p2), %vm416_vm6, %v1285_v26 }
  0x40   : > { %1011 = vmatprep.subr.mxu0 %v304_v4  ;;  %423 = vst.msk [vmem:[#allocation3] sm:$0xff] (%p410_p2), %vm416_vm6, %v1286_v35  ;;  %425 = vst.msk [vmem:[#allocation3 + $0x10] sm:$0xff] (%p410_p2), %vm416_vm6, %v1286_v35 }
  0x41   : > { %1012 = vmatpush3.msra.mxu0 %v304_v4  ;;  %vm407_vm3 = vcmp.eq.s32.totalorder %v1417_v11, 0  ;;  %vm408_vm4 = vcmp.eq.s32.totalorder %v1417_v11, 1  ;;  %vm409_vm5 = vcmp.eq.s32.totalorder %v1417_v11, 2  ;;  %426 = vst.msk [vmem:[#allocation3 + $0x18] sm:$0xff] (%p410_p2), %vm416_vm6, %v1286_v35  ;;  %427 = vst.msk [vmem:[#allocation3 + $0x20] sm:$0xff] (%p410_p2), %vm416_vm6, %v1286_v35 }
  0x42   : > { %1014 = vmatmul.mubr.msk.f32.vlgmr.msra.gmra.mxu0 %vm315_vm0, %v303_v5  ;;  %1016 = vmatprep.subr.mxu0 (%p410_p2), %v432_v17  ;;  %428 = vst.msk [vmem:[#allocation3 + $0x28] sm:$0xff] (%p410_p2), %vm416_vm6, %v1286_v35  ;;  %424 = vst.msk [vmem:[#allocation3 + $0x8] sm:$0xff] (%p410_p2), %vm416_vm6, %v1286_v35 }
  0x43   : > { %1024 = vmatprep.mubr.msk.f32.mxu0 (%p410_p2), %vm315_vm0, %v302_v2  ;;  %1017 = vmatpush3.msra.mxu0 (%p410_p2), %v432_v17 }
  0x44   : > { %1018 = vmatprep.subr.mxu0 (%p410_p2), %v431_v18 }
  0x45   : > { %1019 = vmatpush3.msra.mxu0 (%p410_p2), %v431_v18 }
  0x46   : > { %1020 = vmatprep.subr.mxu0 (%p410_p2), %v430_v19 }
  0x47   : > { %1021 = vmatpush3.msra.mxu0 (%p410_p2), %v430_v19 }
  0x48   : > { %1022 = vmatprep.subr.mxu0 (%p410_p2), %v429_v20 }
  0x49   : > { %1023 = vmatpush3.msra.mxu0 (%p410_p2), %v429_v20 }
  0x4a   : > { %1025 = vmatmul.mubr.msk.f32.vlgmr.msra.gmra.mxu0 (%p410_p2), %vm315_vm0, %v303_v5 }
 0x101   : > { %415 = sbr.rel (!%p410_p2) target bundleno = 570 (0x23a), region = 56 }
 0x102   : > { %v1015_v13 = vpop.f32.mrf.mxu0 }
 0x103   : > { %v1426_v14 = vadd.f32 %v1015_v13, %v977_v12 }
 0x104   : > { %v388_v15 = vpop.f32.mrf.mxu0 }
 0x105   : > { %v1428_v16 = vadd.f32 %v977_v12, %v388_v15 }
 0x10a   : > { %v1026_v22 = vpop.f32.mrf.mxu0 }
 0x10b   : > { %v512_v23 = vadd.f32 %v1026_v22, %v981_v21 }
 0x10c   : > { %v506_v24 = vpop.f32.mrf.mxu0 }
 0x10d   : > { %516 = vst [vmem:[#allocation5 + $0x8] sm:$0xff] %v512_v23  ;;  %v507_v25 = vadd.f32 %v981_v21, %v506_v24 }
 0x10f   : > { %515 = vst [vmem:[#allocation5] sm:$0xff] %v507_v25  ;;  %517 = vmax.xlane.f32.xlu0 %v507_v25 }
 0x113   : > { %519 = vmax.xlane.f32.xlu0 %v512_v23 }
 0x198   : > { %v518_v27 = vpop.xlane.xlu0 %517 }
 0x199   : > { %521 = vst.msk [vmem:[#allocation2] sm:$0xff] %vm416_vm6, %v518_v27  ;;  %v523_v28 = vsub.f32 %v507_v25, %v518_v27 }
 0x19b   : > { %v525_v29 = vmul.f32 1.442695, %v523_v28 }
 0x19c   : > { %v520_v30 = vpop.xlane.xlu0 %519 }
 0x19d   : > { %1105 = vpow2.f32 %v525_v29  ;;  %522 = vst.msk [vmem:[#allocation2 + $0x8] sm:$0xff] %vm416_vm6, %v520_v30  ;;  %v524_v31 = vsub.f32 %v512_v23, %v520_v30 }
 0x19f   : > { %v527_v32 = vmul.f32 1.442695, %v524_v31 }
 0x1a1   : > { %1107 = vpow2.f32 %v527_v32 }
 0x1aa   : > { %v1106_v33 = vpop.eup %1105 }
 0x1ab   : > { %529 = vadd.xlane.f32.xlu1 %v1106_v33 }
 0x1ae   : > { %v1108_v34 = vpop.eup %1107 }
 0x1af   : > { %531 = vadd.xlane.f32.xlu1 %v1108_v34 }
 0x234   : > { %v530_v36 = vpop.xlane.xlu1 %529 }
 0x235   : > { %533 = vst.msk [vmem:[#allocation3] sm:$0xff] %vm416_vm6, %v530_v36 }
 0x238   : > { %v532_v37 = vpop.xlane.xlu1 %531 }
 0x239   : > { %534 = vst.msk [vmem:[#allocation3 + $0x8] sm:$0xff] %vm416_vm6, %v532_v37 }
 0x23a PF: > { %p984_p3 = scmp.ne.s32.totalorder %s1269_s18, 0 }
 0x23c   : > { %537 = sbr.rel (%p984_p3) target bundleno = 1033 (0x409), region = 60 }
 0x241   : > { %v556_v38 = vsel %vm407_vm3, %v1428_v16, -1e+30  ;;  %v557_v39 = vsel %vm407_vm3, %v1426_v14, -1e+30  ;;  %v568_v40 = vsel %vm408_vm4, %v1428_v16, -1e+30 }
 0x242   : > { %v558_v41 = vsel %vm315_vm0, %v556_v38, -inf  ;;  %v570_v42 = vsel %vm315_vm0, %v568_v40, -inf  ;;  %v569_v43 = vsel %vm408_vm4, %v1426_v14, -1e+30  ;;  %v561_v44 = vsel %vm315_vm0, %v557_v39, -inf  ;;  %v1476_v51 = vld [vmem:[#allocation2] sm:$0xff] }
 0x243   : > { %559 = vmax.xlane.f32.xlu0 %v558_v41  ;;  %571 = vmax.xlane.f32.xlu1 %v570_v42  ;;  %v573_v45 = vsel %vm315_vm0, %v569_v43, -inf  ;;  %v580_v46 = vsel %vm409_vm5, %v1428_v16, -1e+30  ;;  %v581_v47 = vsel %vm409_vm5, %v1426_v14, -1e+30  ;;  %v1287_v50 = vmov 0  }
 0x244   : > { %v582_v48 = vsel %vm315_vm0, %v580_v46, -inf  ;;  %v585_v49 = vsel %vm315_vm0, %v581_v47, -inf  ;;  %1109 = vset.pattern.permute.xlu0 %v1287_v50  ;;  %1110 = vset.pattern.permute.xlu1 %v1287_v50  ;;  %v1478_v52 = vld [vmem:[#allocation2 + $0x10] sm:$0xff]  ;;  %vm640_vm7 = vcmask 7168   ;;  %v1486_v57 = vld [vmem:[#allocation2 + $0x8] sm:$0xff]  ;;  %v1488_v58 = vld [vmem:[#allocation2 + $0x18] sm:$0xff] }
 0x245   : > { %v1503_v1 = vld [vmem:[#allocation2 + $0x20] sm:$0xff]  ;;  %v1505_v2 = vld [vmem:[#allocation2 + $0x28] sm:$0xff] }
 0x247   : > { %562 = vmax.xlane.f32.xlu0 %v561_v44  ;;  %574 = vmax.xlane.f32.xlu1 %v573_v45 }
 0x24b   : > { %583 = vmax.xlane.f32.xlu0 %v582_v48  ;;  %586 = vmax.xlane.f32.xlu1 %v585_v49 }
 0x2cc   : > { %v560_v53 = vpop.xlane.xlu0 %559  ;;  %v572_v54 = vpop.xlane.xlu1 %571 }
 0x2cd   : > { %v1481_v55 = vmax.f32 %v1476_v51, %v560_v53  ;;  %v1484_v56 = vmax.f32 %v1478_v52, %v572_v54 }
 0x2cf   : > { %641 = vst.msk [vmem:[#allocation2] sm:$0xff] %vm640_vm7, %v1481_v55  ;;  %v643_v59 = vsub.f32 %v1476_v51, %v1481_v55  ;;  %592 = vperm.xlu0 %1109, %v1481_v55   ;;  %663 = vst.msk [vmem:[#allocation2 + $0x10] sm:$0xff] %vm640_vm7, %v1484_v56  ;;  %v665_v60 = vsub.f32 %v1478_v52, %v1484_v56  ;;  %v546_v52 = vld [vmem:[#allocation3] sm:$0xff]  ;;  %v547_v51 = vld [vmem:[#allocation3 + $0x8] sm:$0xff] }
 0x2d0   : > { %v563_v61 = vpop.xlane.xlu0 %562  ;;  %v575_v62 = vpop.xlane.xlu1 %574 }
 0x2d1   : > { %v565_v63 = vmax.f32 %v1486_v57, %v563_v61  ;;  %v1501_v0 = vmax.f32 %v1488_v58, %v575_v62  ;;  %v645_v44 = vmul.f32 1.442695, %v643_v59  ;;  %v667_v45 = vmul.f32 1.442695, %v665_v60 }
 0x2d3   : > { %642 = vst.msk [vmem:[#allocation2 + $0x8] sm:$0xff] %vm640_vm7, %v565_v63  ;;  %v644_v3 = vsub.f32 %v1486_v57, %v565_v63  ;;  %597 = vperm.xlu1 %1110, %v565_v63   ;;  %664 = vst.msk [vmem:[#allocation2 + $0x18] sm:$0xff] %vm640_vm7, %v1501_v0  ;;  %v666_v4 = vsub.f32 %v1488_v58, %v1501_v0  ;;  %v549_v58 = vld [vmem:[#allocation3 + $0x10] sm:$0xff] }
 0x2d4   : > { %v584_v5 = vpop.xlane.xlu0 %583  ;;  %v587_v6 = vpop.xlane.xlu1 %586 }
 0x2d5   : > { %v588_v7 = vmax.f32 %v1503_v1, %v584_v5  ;;  %v589_v8 = vmax.f32 %v1505_v2, %v587_v6  ;;  %v647_v46 = vmul.f32 1.442695, %v644_v3  ;;  %v669_v47 = vmul.f32 1.442695, %v666_v4 }
 0x2d7   : > { %604 = vperm.xlu1 %1110, %v1484_v56   ;;  %685 = vst.msk [vmem:[#allocation2 + $0x20] sm:$0xff] %vm640_vm7, %v588_v7  ;;  %v687_v9 = vsub.f32 %v1503_v1, %v588_v7  ;;  %686 = vst.msk [vmem:[#allocation2 + $0x28] sm:$0xff] %vm640_vm7, %v589_v8  ;;  %v688_v10 = vsub.f32 %v1505_v2, %v589_v8  ;;  %v550_v1 = vld [vmem:[#allocation3 + $0x18] sm:$0xff]  ;;  %v552_v2 = vld [vmem:[#allocation3 + $0x20] sm:$0xff] }
 0x2d9   : > { %v689_v48 = vmul.f32 1.442695, %v687_v9  ;;  %v691_v49 = vmul.f32 1.442695, %v688_v10  ;;  %v553_v10 = vld [vmem:[#allocation3 + $0x28] sm:$0xff] }
 0x2db   : > { %609 = vperm.xlu1 %1110, %v1501_v0  }
 0x2df   : > { %616 = vperm.xlu1 %1110, %v588_v7  }
 0x2e3   : > { %621 = vperm.xlu1 %1110, %v589_v8  }
 0x34a   : > { %v593_v15 = vpop.permute.xlu0 %592 }
 0x34b   : > { %v600_v18 = vsel %vm407_vm3, %v593_v15, 0.0 }
 0x34e   : > { %v598_v12 = vpop.permute.xlu1 %597 }
 0x34f   : > { %v601_v23 = vsel %vm407_vm3, %v598_v12, 0.0 }
 0x352   : > { %v605_v13 = vpop.permute.xlu1 %604 }
 0x353   : > { %v612_v19 = vsel %vm408_vm4, %v605_v13, %v600_v18 }
 0x356   : > { %v610_v17 = vpop.permute.xlu1 %609 }
 0x357   : > { %v613_v24 = vsel %vm408_vm4, %v610_v17, %v601_v23 }
 0x35a   : > { %v617_v20 = vpop.permute.xlu1 %616 }
 0x35b   : > { %v624_v21 = vsel %vm409_vm5, %v617_v20, %v612_v19 }
 0x35c   : > { %v626_v22 = vsub.f32 %v1428_v16, %v624_v21 }
 0x35e   : > { %v628_v25 = vmul.f32 1.442695, %v626_v22  ;;  %v622_v26 = vpop.permute.xlu1 %621 }
 0x35f   : > { %v625_v27 = vsel %vm409_vm5, %v622_v26, %v613_v24 }
 0x360   : > { %1111 = vpow2.f32 %v628_v25  ;;  %v627_v28 = vsub.f32 %v1426_v14, %v625_v27 }
 0x362   : > { %v630_v29 = vmul.f32 1.442695, %v627_v28 }
 0x364   : > { %1113 = vpow2.f32 %v630_v29 }
 0x365   : > { %1115 = vpow2.f32 %v645_v44 }
 0x366   : > { %1117 = vpow2.f32 %v667_v45 }
 0x367   : > { %1119 = vpow2.f32 %v647_v46 }
 0x368   : > { %1121 = vpow2.f32 %v669_v47 }
 0x369   : > { %1123 = vpow2.f32 %v689_v48 }
 0x36a   : > { %1125 = vpow2.f32 %v691_v49 }
 0x36d   : > { %v1112_v30 = vpop.eup %1111 }
 0x36e   : > { %v632_v31 = vsel %vm407_vm3, %v1112_v30, 0.0  ;;  %v655_v33 = vsel %vm408_vm4, %v1112_v30, 0.0  ;;  %v677_v38 = vsel %vm409_vm5, %v1112_v30, 0.0 }
 0x36f   : > { %v634_v32 = vsel %vm315_vm0, %v632_v31, 0.0  ;;  %v657_v37 = vsel %vm315_vm0, %v655_v33, 0.0  ;;  %v679_v40 = vsel %vm315_vm0, %v677_v38, 0.0 }
 0x370   : > { %635 = vadd.xlane.f32.xlu1 %v634_v32 }
 0x371   : > { %v1114_v34 = vpop.eup %1113 }
 0x372   : > { %v633_v35 = vsel %vm407_vm3, %v1114_v34, 0.0  ;;  %v656_v39 = vsel %vm408_vm4, %v1114_v34, 0.0  ;;  %v678_v42 = vsel %vm409_vm5, %v1114_v34, 0.0  ;;  %v1116_v50 = vpop.eup %1115 }
 0x373   : > { %v637_v36 = vsel %vm315_vm0, %v633_v35, 0.0  ;;  %v660_v41 = vsel %vm315_vm0, %v656_v39, 0.0  ;;  %v682_v43 = vsel %vm315_vm0, %v678_v42, 0.0  ;;  %v1118_v53 = vpop.eup %1117  ;;  %v649_v54 = vmul.f32 %v1116_v50, %v546_v52 }
 0x374   : > { %638 = vadd.xlane.f32.xlu0 %v637_v36  ;;  %658 = vadd.xlane.f32.xlu1 %v657_v37  ;;  %v1120_v56 = vpop.eup %1119  ;;  %v671_v60 = vmul.f32 %v1118_v53, %v549_v58 }
 0x375   : > { %v1122_v59 = vpop.eup %1121  ;;  %v650_v61 = vmul.f32 %v1120_v56, %v547_v51 }
 0x376   : > { %v1124_v62 = vpop.eup %1123  ;;  %v672_v5 = vmul.f32 %v1122_v59, %v550_v1 }
 0x377   : > { %v693_v6 = vmul.f32 %v1124_v62, %v552_v2  ;;  %v1126_v7 = vpop.eup %1125 }
 0x378   : > { %680 = vadd.xlane.f32.xlu0 %v679_v40  ;;  %661 = vadd.xlane.f32.xlu1 %v660_v41  ;;  %v694_v15 = vmul.f32 %v1126_v7, %v553_v10 }
 0x37c   : > { %683 = vadd.xlane.f32.xlu1 %v682_v43 }
 0x3f9   : > { %v636_v57 = vpop.xlane.xlu1 %635 }
 0x3fa   : > { %v651_v55 = vadd.f32 %v649_v54, %v636_v57 }
 0x3fc   : > { %653 = vst.msk [vmem:[#allocation3] sm:$0xff] %vm640_vm7, %v651_v55 }
 0x3fd   : > { %v659_v63 = vpop.xlane.xlu1 %658  ;;  %v639_v0 = vpop.xlane.xlu0 %638 }
 0x3fe   : > { %v673_v3 = vadd.f32 %v671_v60, %v659_v63  ;;  %v652_v4 = vadd.f32 %v650_v61, %v639_v0 }
 0x400   : > { %675 = vst.msk [vmem:[#allocation3 + $0x10] sm:$0xff] %vm640_vm7, %v673_v3  ;;  %654 = vst.msk [vmem:[#allocation3 + $0x8] sm:$0xff] %vm640_vm7, %v652_v4 }
 0x401   : > { %v662_v8 = vpop.xlane.xlu1 %661  ;;  %v681_v9 = vpop.xlane.xlu0 %680 }
 0x402   : > { %v674_v12 = vadd.f32 %v672_v5, %v662_v8  ;;  %v695_v13 = vadd.f32 %v693_v6, %v681_v9 }
 0x404   : > { %676 = vst.msk [vmem:[#allocation3 + $0x18] sm:$0xff] %vm640_vm7, %v674_v12  ;;  %697 = vst.msk [vmem:[#allocation3 + $0x20] sm:$0xff] %vm640_vm7, %v695_v13 }
 0x405   : > { %v684_v17 = vpop.xlane.xlu1 %683 }
 0x406   : > { %v696_v18 = vadd.f32 %v694_v15, %v684_v17 }
 0x408   : > { %698 = vst.msk [vmem:[#allocation3 + $0x28] sm:$0xff] %vm640_vm7, %v696_v18 }
 0x409 PF: > { %p699_p5 = scmp.eq.s32.totalorder %s1269_s18, 1 }
 0x40a   : > { %v706_v19 = vld [vmem:[#allocation3] sm:$0xff] (%p699_p5)  ;;  %v707_v21 = vld [vmem:[#allocation3 + $0x8] sm:$0xff] (%p699_p5)  ;;  %v727_v23 = vld [vmem:[#allocation3 + $0x10] sm:$0xff] (%p699_p5)  ;;  %s1288_s30 = smov (%p699_p5), 1   ;;  %vm716_vm8 = vcmask (%p699_p5), 7168   ;;  %s1289_s6 = smov (%p699_p5), 127  }
 0x40b   : > { %703 = sbr.rel (!%p699_p5) target bundleno = 1292 (0x50c), region = 64  ;;  %1127 = vlog2.f32 (%p699_p5), %v706_v19  ;;  %v754_v20 = vld [vmem:[#allocation3 + $0x20] sm:$0xff] (%p699_p5)  ;;  %v728_v24 = vld [vmem:[#allocation3 + $0x18] sm:$0xff] (%p699_p5)  ;;  %v704_v26 = vld [vmem:[#allocation2] sm:$0xff] (%p699_p5) }
 0x40c   : > { %1129 = vlog2.f32 (%p699_p5), %v754_v20  ;;  %v751_v29 = vld [vmem:[#allocation2 + $0x20] sm:$0xff] (%p699_p5)  ;;  %v705_v32 = vld [vmem:[#allocation2 + $0x8] sm:$0xff] (%p699_p5)  ;;  %v719_v40 = vld [vmem:[#allocation5] sm:$0xff] (%p699_p5) }
 0x40d   : > { %1131 = vlog2.f32 (%p699_p5), %v707_v21  ;;  %v752_v36 = vld [vmem:[#allocation2 + $0x28] sm:$0xff] (%p699_p5)  ;;  %v724_v41 = vld [vmem:[#allocation2 + $0x10] sm:$0xff] (%p699_p5)  ;;  %v720_v50 = vld [vmem:[#allocation5 + $0x8] sm:$0xff] (%p699_p5) }
 0x40e   : > { %v725_v52 = vld [vmem:[#allocation2 + $0x18] sm:$0xff] (%p699_p5) }
 0x40f   : > { %v755_v22 = vld [vmem:[#allocation3 + $0x28] sm:$0xff] (%p699_p5) }
 0x410   : > { %1133 = vlog2.f32 %v755_v22 }
 0x411   : > { %1135 = vlog2.f32 %v727_v23 }
 0x412   : > { %1137 = vlog2.f32 %v728_v24 }
 0x418   : > { %v1128_v25 = vpop.eup %1127 }
 0x419   : > { %v1130_v27 = vpop.eup %1129  ;;  %v709_v28 = vmul.f32 0.6931472, %v1128_v25 }
 0x41a   : > { %v1132_v30 = vpop.eup %1131  ;;  %v757_v31 = vmul.f32 0.6931472, %v1130_v27 }
 0x41b   : > { %v712_v34 = vadd.f32 %v709_v28, %v704_v26  ;;  %v711_v35 = vmul.f32 0.6931472, %v1132_v30 }
 0x41c   : > { %v760_v38 = vadd.f32 %v757_v31, %v751_v29 }
 0x41d   : > { %v1134_v33 = vpop.eup %1133  ;;  %742 = vrot.lane.b32.xlu0 %v712_v34, %s1288_s30  ;;  %v714_v42 = vsub.f32 0.0, %v712_v34  ;;  %v713_v43 = vadd.f32 %v711_v35, %v705_v32  ;;  %v721_v45 = vsub.f32 %v719_v40, %v712_v34 }
 0x41e   : > { %v1136_v37 = vpop.eup %1135  ;;  %v759_v39 = vmul.f32 0.6931472, %v1134_v33  ;;  %764 = vrot.lane.b32.xlu1 %v760_v38, %s1288_s30 }
 0x41f   : > { %v730_v44 = vmul.f32 0.6931472, %v1136_v37  ;;  %v715_v47 = vsub.f32 0.0, %v713_v43  ;;  %717 = vst.msk [vmem:[#allocation4] sm:$0xff] %vm716_vm8, %v714_v42  ;;  %v1138_v49 = vpop.eup %1137  ;;  %v722_v54 = vsub.f32 %v720_v50, %v713_v43 }
 0x420   : > { %v761_v46 = vadd.f32 %v759_v39, %v752_v36  ;;  %v732_v56 = vmul.f32 0.6931472, %v1138_v49 }
 0x421   : > { %v733_v48 = vadd.f32 %v730_v44, %v724_v41  ;;  %744 = vrot.lane.b32.xlu0 %v713_v43, %s1288_s30  ;;  %718 = vst.msk [vmem:[#allocation4 + $0x8] sm:$0xff] %vm716_vm8, %v715_v47 }
 0x422   : > { %766 = vrot.lane.b32.xlu1 %v761_v46, %s1288_s30  ;;  %v734_v57 = vadd.f32 %v732_v56, %v725_v52 }
 0x423   : > { %v735_v53 = vsub.f32 %v721_v45, %v733_v48 }
 0x424   : > { %v736_v58 = vsub.f32 %v722_v54, %v734_v57 }
 0x425   : > { %738 = vst.msk [vmem:[#allocation4 + $0x10] sm:$0xff] %vm716_vm8, %v735_v53 }
 0x426   : > { %739 = vst.msk [vmem:[#allocation4 + $0x18] sm:$0xff] %vm716_vm8, %v736_v58 }
 0x48f   : > { %v743_v51 = vpop.permute.xlu0 %742 }
 0x490   : > { %v748_v55 = vsub.f32 %v719_v40, %v743_v51  ;;  %v765_v59 = vpop.permute.xlu1 %764 }
 0x492   : > { %v770_v60 = vsub.f32 %v748_v55, %v765_v59 }
 0x493   : > { %v745_v61 = vpop.permute.xlu0 %744 }
 0x494   : > { %v749_v62 = vsub.f32 %v720_v50, %v745_v61  ;;  %774 = vrot.lane.b32.xlu0 %v770_v60, %s1289_s6  ;;  %v767_v63 = vpop.permute.xlu1 %766 }
 0x496   : > { %v771_v0 = vsub.f32 %v749_v62, %v767_v63 }
 0x498   : > { %776 = vrot.lane.b32.xlu1 %v771_v0, %s1289_s6 }
 0x506   : > { %v775_v1 = vpop.permute.xlu0 %774 }
 0x507   : > { %781 = vst.msk [vmem:[#allocation4 + $0x20] sm:$0xff] %vm716_vm8, %v775_v1 }
 0x50a   : > { %v777_v2 = vpop.permute.xlu1 %776 }
 0x50b   : > { %782 = vst.msk [vmem:[#allocation4 + $0x28] sm:$0xff] %vm716_vm8, %v777_v2 }
 0x50c PF: > { %p986_p7 = scmp.ne.s32.totalorder %s1269_s18, 1 }
 0x50e   : > { %785 = sbr.rel (%p986_p7) target bundleno = 1437 (0x59d), region = 68 }
 0x513   : > { %v803_v3 = vld [vmem:[#allocation4 + $0x10] sm:$0xff]  ;;  %v786_v4 = vld [vmem:[#allocation4] sm:$0xff]  ;;  %v1290_v5 = vmov 0   ;;  %v804_v6 = vld [vmem:[#allocation4 + $0x18] sm:$0xff] }
 0x514   : > { %1140 = vset.pattern.permute.xlu1 %v1290_v5  ;;  %1139 = vset.pattern.permute.xlu0 %v1290_v5  ;;  %v787_v7 = vld [vmem:[#allocation4 + $0x8] sm:$0xff]  ;;  %v820_v9 = vld [vmem:[#allocation4 + $0x20] sm:$0xff] }
 0x515   : > { %809 = vperm.xlu1 %1140, %v803_v3   ;;  %792 = vperm.xlu0 %1139, %v786_v4   ;;  %v821_v8 = vld [vmem:[#allocation4 + $0x28] sm:$0xff] }
 0x519   : > { %814 = vperm.xlu1 %1140, %v804_v6   ;;  %797 = vperm.xlu0 %1139, %v787_v7  }
 0x51d   : > { %831 = vperm.xlu1 %1140, %v821_v8   ;;  %826 = vperm.xlu0 %1139, %v820_v9  }
 0x590   : > { %v810_v10 = vpop.permute.xlu1 %809  ;;  %v793_v12 = vpop.permute.xlu0 %792 }
 0x591   : > { %v800_v17 = vsel %vm407_vm3, %v793_v12, 0.0 }
 0x592   : > { %v817_v21 = vsel %vm408_vm4, %v810_v10, %v800_v17 }
 0x594   : > { %v815_v13 = vpop.permute.xlu1 %814  ;;  %v798_v15 = vpop.permute.xlu0 %797 }
 0x595   : > { %v801_v18 = vsel %vm407_vm3, %v798_v15, 0.0 }
 0x596   : > { %v818_v20 = vsel %vm408_vm4, %v815_v13, %v801_v18 }
 0x598   : > { %v832_v19 = vpop.permute.xlu1 %831  ;;  %v827_v22 = vpop.permute.xlu0 %826 }
 0x599   : > { %v835_v23 = vsel %vm409_vm5, %v832_v19, %v818_v20  ;;  %v834_v24 = vsel %vm409_vm5, %v827_v22, %v817_v21 }
 0x59a   : > { %v837_v25 = vadd.f32 %v835_v23, %v1426_v14  ;;  %v836_v26 = vadd.f32 %v834_v24, %v1428_v16 }
 0x59c   : > { %839 = vst.msk [vmem:[#allocation12 + $0x8] sm:$0xff] %vm315_vm0, %v837_v25  ;;  %838 = vst.msk [vmem:[#allocation12] sm:$0xff] %vm315_vm0, %v836_v26 }
 0x59d PF: > { %p1588_p10 = scmp.eq.s32.totalorder %s966_s21, 1  ;;  %s1291_s7 = smov [#allocation12]  }
 0x59e   : > { %s856_s8 = sshll.u32 %s1291_s7, 4  ;;  %s857_s8 = int_to_ptr.vmem [resolvable:$true] %s856_s8 }
 0x59f   : > { %s1219_s9 = scalar_lea.vmem %s857_s8, 256  ;;  %s1225_s10 = scalar_lea.vmem %s857_s8, 512 }
 0x5a0   : > { %p1220_p11 = scmp.ne.s32.totalorder %s857_s8, %s1219_s9  ;;  %p1226_p13 = scmp.lt.s32.totalorder %s857_s8, %s857_s8 }
 0x5a1   : > { %p1227_p0 = scmp.lt.s32.totalorder %s1225_s10, %s1219_s9 }
 0x5a2   : > { %p1221_p12 = pnand %p1220_p11, %p1588_p10 }
 0x5a3   : > { %p1228_p1 = por %p1227_p0, %p1226_p13 }
 0x5a4   : > { %p1222_p6 = pneg %p1221_p12 }
 0x5a6   : > { %p1229_p4 = pnand %p1228_p1, %p1222_p6 }
 0x5a8   : > { %1232 = shalt.err (!%p1229_p4)
}
 0x5a9   : > { %s1292_s11 = smov 128   ;;  %s1293_s21 = smov 8  }
 0x5aa   : > { %1040 = dma.vmem_to_hbm [thread:$0]  (%p1588_p10), %s857_s8, 256, %s1616_s5, [#allocation8], %s1292_s11, %s1292_s11, %s1293_s21  }
 0x5ab PF: > { %p1064_p8 = scmp.ge.s32.totalorder %s1277_s20, 2  ;;  %p1065_p9 = scmp.eq.s32.totalorder %s967_s22, 1 }
 0x5ad   : > { %p1054_p2 = pnand %p1065_p9, %p1064_p8 }
 0x5af   : > { %p1055_p3 = pneg %p1054_p2 }
 0x5b1   : > { %1264 = dma.done.wait (%p1055_p3), [#allocation8], 256  }
 0x5b2   : > { %1266 = vsyncadd (%p1055_p3), [#allocation8], 4294967040  ;;  %s20_s20 = sadd.s32 1, %s1277_s20   ;;  %s1622_s18 = smov %s1273_s19 }
 0x5b3   : > { %p17_p5 = scmp.ge.s32.totalorder %s20_s20, 4   ;;  %s1623_s19 = smov %s1625_s28 }
 0x5b5   :  { %19 = sbr.rel (!%p17_p5) target bundleno = 5 (0x5), region = 118 }
 0x5ba   :  { %877 = vsyncpa [#allocation7], 1 }
 0x5bb   :  { %879 = vsyncpa [#allocation7 + $0x1], 1 }
 0x5bc   :  { %880 = vsyncpa [#allocation10], 1 }
 0x5bd   :  { %881 = vsyncpa [#allocation8], 1 }
 0x5be   :  { %883 = vsyncpa [#allocation8 + $0x1], 1 }

</bundles_post_ra>
